<compile_context>
chip_gen: v7x
topology: tpu7x:2x2x1
jax: 0.10.0
libtpu: 0.0.40
codegen_flags: <defaults>
</compile_context>

<pallas_src>
import jax
import jax.numpy as jnp
from jax.experimental import pallas as pl
from jax.experimental.pallas import tpu as pltpu


# --------------------------------------------------------------------------
# Path "dma": single HBM->HBM async copy, no VMEM staging.
# --------------------------------------------------------------------------
def _dma_copy_kernel(x_hbm_ref, o_hbm_ref, sem):
    cp = pltpu.make_async_copy(x_hbm_ref, o_hbm_ref, sem)
    cp.start()
    cp.wait()


def _dma_copy(x: jax.Array) -> jax.Array:
    nbytes = x.size * jnp.dtype(x.dtype).itemsize
    return pl.pallas_call(
        _dma_copy_kernel,
        out_shape=jax.ShapeDtypeStruct(x.shape, x.dtype),
        in_specs=[pl.BlockSpec(memory_space=pl.ANY)],
        out_specs=pl.BlockSpec(memory_space=pl.ANY),
        scratch_shapes=[pltpu.SemaphoreType.DMA(())],
        cost_estimate=pl.CostEstimate(
            flops=0, transcendentals=0, bytes_accessed=2 * nbytes),
    )(x)


# --------------------------------------------------------------------------
# Path "tiled": lane-dense VMEM-staged copy (subclass template).
# --------------------------------------------------------------------------
def _identity_copy_kernel(x_ref, o_ref):
    # Pure pass-through: the "forward" of an abstract base model.
    o_ref[...] = x_ref[...]


def _sublane_packing(dtype) -> int:
    """Native sublane packing: 8 for 4-byte, 16 for 2-byte, 32 for 1-byte."""
    itemsize = jnp.dtype(dtype).itemsize
    return max(8, 32 // itemsize)


def _choose_flat_layout(total: int, dtype, max_tile_bytes: int = 8 << 20):
    """Pick a lane-dense (rows, lanes, tile_rows) tiling for a flat copy.

    Returns None if the element count is not a multiple of 128 (caller pads).
    """
    if total % 128 != 0:
        return None

    # Prefer wider lane dims: large multiples of 128 -> unmasked full stores.
    lanes = 512 if total % 512 == 0 else (256 if total % 256 == 0 else 128)
    rows = total // lanes

    itemsize = jnp.dtype(dtype).itemsize
    packing = _sublane_packing(dtype)

    # 8 MiB tile cap: in + out, double-buffered => 32 MiB of buffers, which
    # fits under v7x's 64 MiB physical VMEM (with vmem_limit_bytes raised)
    # and is trivially fine on v5e/v6e (128 MiB).
    cap_rows = max(packing, (max_tile_bytes // (lanes * itemsize)) // packing * packing)

    if rows <= cap_rows:
        # Full-extent block along rows: always layout-legal, single grid step.
        return rows, lanes, rows

    # Prefer a tile_rows that evenly divides rows (no masked ragged tail),
    # and is a multiple of the dtype's sublane packing.
    tile_rows = 0
    t = cap_rows
    while t >= packing:
        if rows % t == 0:
            tile_rows = t
            break
        t -= packing
    if tile_rows == 0:
        tile_rows = cap_rows  # ragged last block; Pallas masks it (correct).
    return rows, lanes, tile_rows


def _tiled_copy(x: jax.Array) -> jax.Array:
    orig_shape = x.shape
    total = x.size
    dtype = x.dtype
    itemsize = jnp.dtype(dtype).itemsize

    layout = _choose_flat_layout(total, dtype)
    pad = 0
    if layout is None:
        # TODO(synk): element count not divisible by 128 — pad the flat view
        # up to a sublane/lane-aligned slab and slice afterwards (costs one
        # extra padded write, but never blows the VMEM budget).
        chunk = 128 * _sublane_packing(dtype)
        pad = (-total) % chunk
        flat = jnp.pad(x.reshape(-1), (0, pad))
        layout = _choose_flat_layout(total + pad, dtype)
        rows, lanes, tile_rows = layout
        flat = flat.reshape(rows, lanes)
    else:
        rows, lanes, tile_rows = layout
        flat = x.reshape(rows, lanes)

    grid = (pl.cdiv(rows, tile_rows),)
    out = pl.pallas_call(
        _identity_copy_kernel,
        out_shape=jax.ShapeDtypeStruct((rows, lanes), dtype),
        grid_spec=pl.GridSpec(
            grid=grid,
            in_specs=[pl.BlockSpec((tile_rows, lanes), lambda i: (i, 0))],
            out_specs=pl.BlockSpec((tile_rows, lanes), lambda i: (i, 0)),
        ),
        compiler_params=pltpu.CompilerParams(
            dimension_semantics=("parallel",),
            vmem_limit_bytes=40 << 20,
        ),
        cost_estimate=pl.CostEstimate(
            flops=0, transcendentals=0,
            bytes_accessed=2 * rows * lanes * itemsize),
    )(flat)

    if pad:
        out = out.reshape(-1)[:total]
    return out.reshape(orig_shape)


# --------------------------------------------------------------------------
# Public forward
# --------------------------------------------------------------------------
def base_model_forward(x: jax.Array, *, mode: str = "skip") -> jax.Array:
    """Identity forward for the abstract BaseModel.

    mode="skip"  : return x untouched (zero extra HBM traffic; the right call
                   for a literal identity).
    mode="dma"   : one HBM->HBM DMA inside a Pallas kernel (on-device copy at
                   the HBM roofline, no VMEM staging).
    mode="tiled" : lane-dense tiled VMEM-staged copy — the template subclasses
                   extend with real per-tile compute.
    """
    if mode == "skip":
        return x
    if mode == "dma":
        return _dma_copy(x)
    if mode == "tiled":
        return _tiled_copy(x)
    raise ValueError(f"unknown mode: {mode!r}")


if __name__ == "__main__":
    key = jax.random.PRNGKey(0)
    # Small CIFAR-like input: batch=2, channels=4, spatial=16x16 (NCHW).
    x = jax.random.normal(key, (2, 4, 16, 16), dtype=jnp.float32)

    y_skip = base_model_forward(x)                 # default: no copy at all
    y_dma = base_model_forward(x, mode="dma")      # HBM->HBM DMA kernel
    y_tiled = base_model_forward(x, mode="tiled")  # tiled VMEM copy template
    jax.block_until_ready((y_skip, y_dma, y_tiled))

    for y in (y_skip, y_dma, y_tiled):
        assert y.shape == x.shape and y.dtype == x.dtype
        assert bool(jnp.array_equal(y, x))

    print("KERNEL_OK")
</pallas_src>

<mosaic_0001>
module attributes {stable_mosaic.version = 11 : i64} {
  func.func @_dma_copy_kernel(%arg0: memref<2x4x16x16xf32, #tpu.memory_space<any>>, %arg1: memref<2x4x16x16xf32, #tpu.memory_space<any>>, %arg2: memref<!tpu.dma_semaphore, #tpu.memory_space<semaphore_mem>>) attributes {dimension_semantics = [], scalar_prefetch = 0 : i64, scratch_operands = 1 : i64, tpu.core_type = #tpu.core_type<tc>} {
    tpu.enqueue_dma source(%arg0 : memref<2x4x16x16xf32, #tpu.memory_space<any>>) target(%arg1 : memref<2x4x16x16xf32, #tpu.memory_space<any>>) target_semaphore(%arg2 : memref<!tpu.dma_semaphore, #tpu.memory_space<semaphore_mem>>)
    tpu.wait_dma2 semaphore(%arg2 : memref<!tpu.dma_semaphore, #tpu.memory_space<semaphore_mem>>) src(%arg0 : memref<2x4x16x16xf32, #tpu.memory_space<any>>) dst(%arg1 : memref<2x4x16x16xf32, #tpu.memory_space<any>>)
    return
  }
}

</mosaic_0001>

<bundles_post_ra>
// kernel: tpu_custom_call.1
= control target key start
LH: loop header
LB: loop body
LE: loop exit
PB: predicated region body
PF: predicated region fallthrough
CT: control target
= control target key end

     0   :  { %s36_s6 = smov [#allocation2]   ;;  %s37_s7 = smov [#allocation3]   ;;  %s55_s0 = inlined_call_operand.hbm [shape: f32[2,4,16,16], index: 0, kind: input, shape index: {}]   ;;  %s56_s1 = inlined_call_operand.hbm [shape: f32[2,4,16,16], index: 1, kind: output, shape index: {}]  }
   0x1   :  { %s38_s8 = smov 0  }
   0x2   :  { %18 = dma.general %s55_s0, 2048, %s56_s1, %s36_s6, %s37_s7, [#allocation4], %s38_s8, 0  }
   0x3   :  { %34 = dma.done.wait [#allocation2], 2048 }
   0x4   :  { %35 = vsyncadd [#allocation2], 4294965248 }
   0x5   :  { %24 = vsyncmov [#allocation2] }
   0x8   :  { %s25_s13 = vpop.sfrf %24 }
   0x9   :  { %p30_p0 = scmp.ne.s32.totalorder %s25_s13, 0 }
   0xb   :  { %29 = shalt.err (%p30_p0)  }

</bundles_post_ra>
